<compile_context>
chip_gen: v5e
topology: v5e:2x2
jax: 0.10.0
libtpu: 0.0.40
codegen_flags: <defaults>
</compile_context>

<pallas_src>
import functools

import jax
import jax.numpy as jnp
from jax.experimental import pallas as pl
from jax.experimental.pallas import tpu as pltpu


# ----------------------------------------------------------------------------
# Pallas kernels
# ----------------------------------------------------------------------------

def _class_mlp_kernel(x_ref, w1_ref, b1_ref, w2_ref, b2_ref, w3_ref, b3_ref,
                      o_ref):
  """MLP(d -> d -> d -> d/8), ReLU between layers (no dropout, no sigmoid)."""
  x = x_ref[...]
  h1 = jnp.maximum(
      jnp.dot(x, w1_ref[...], preferred_element_type=jnp.float32)
      + b1_ref[...], 0.0)
  h2 = jnp.maximum(
      jnp.dot(h1, w2_ref[...], preferred_element_type=jnp.float32)
      + b2_ref[...], 0.0)
  o_ref[...] = (
      jnp.dot(h2, w3_ref[...], preferred_element_type=jnp.float32)
      + b3_ref[...])


def _decode_fused_kernel(x_ref, w1_ref, b1_ref, g4_ref, beta4_ref, exp_ref,
                         wf_ref, bf_ref, o_ref, *, d4):
  """Fused decode chain for one (batch, row-tile) grid cell.

  x_ref    : (tm, d)        bf16  input-pixel rows (image tokens)
  w1_ref   : (d, 4*d4)=(d,d) bf16 up1 ConvT(k=2,s=2) as a per-pixel GEMM
  b1_ref   : (1, d)         f32   up1 bias tiled over the 4 sub-pixel groups
  g4_ref   : (1, d)         f32   LayerNorm2d gamma tiled over the 4 groups
  beta4_ref: (1, d)         f32   LayerNorm2d beta tiled over the 4 groups
  exp_ref  : (4, d)         f32   group-indicator matrix (1 where col in grp)
  wf_ref   : (16*n_cls, d)  bf16  per-batch folded (up2 . cls) weight, K = d
  bf_ref   : (16*n_cls, 1)  f32   per-batch folded bias (cls @ up2_b)
  o_ref    : (16*n_cls, tm) f32   scrambled seg logits (lane-dense stores)
  """
  # --- up1: ConvTranspose2d(d -> d4, k=2, s=2) as one per-pixel GEMM --------
  y = (jnp.dot(x_ref[...], w1_ref[...], preferred_element_type=jnp.float32)
       + b1_ref[...])                                   # (tm, d) f32

  # --- LayerNorm2d + GELU over each of the 4 up1 sub-pixel groups -----------
  # Group reductions / broadcasts done with a tiny indicator matmul (MXU) so
  # no lane slicing / concatenation relayouts are needed; stats single-pass.
  expand = exp_ref[...]                                 # (4, d)
  inv_d4 = 1.0 / d4
  mu_g = jax.lax.dot_general(y, expand, (((1,), (1,)), ((), ())),
                             preferred_element_type=jnp.float32) * inv_d4
  sq_g = jax.lax.dot_general(y * y, expand, (((1,), (1,)), ((), ())),
                             preferred_element_type=jnp.float32) * inv_d4
  rstd_g = jax.lax.rsqrt(sq_g - mu_g * mu_g + 1e-6)     # (tm, 4), EUP
  mu = jnp.dot(mu_g, expand, preferred_element_type=jnp.float32)    # (tm, d)
  rstd = jnp.dot(rstd_g, expand, preferred_element_type=jnp.float32)
  # TODO(synk): nn.GELU() default is the exact erf form; tanh approx used.
  act = jax.nn.gelu((y - mu) * (rstd * g4_ref[...]) + beta4_ref[...],
                    approximate=True)
  yb = act.astype(jnp.bfloat16)                         # (tm, d) bf16

  # --- up2 + classify folded into one dense GEMM (K = d, lane-dense out) ----
  seg = jax.lax.dot_general(wf_ref[...], yb, (((1,), (1,)), ((), ())),
                            preferred_element_type=jnp.float32)  # (16c, tm)
  o_ref[...] = seg + bf_ref[...]


# ----------------------------------------------------------------------------
# Pallas wrappers
# ----------------------------------------------------------------------------

def class_mlp(x, p):
  """x: (rows, d) -> (rows, d//8).  rows = b*n_cls is tiny; keep monolithic."""
  m, _ = x.shape
  d8 = p["mlp_w3"].shape[1]
  args = (
      x,
      p["mlp_w1"], p["mlp_b1"].reshape(1, -1),
      p["mlp_w2"], p["mlp_b2"].reshape(1, -1),
      p["mlp_w3"], p["mlp_b3"].reshape(1, -1),
  )
  return pl.pallas_call(
      _class_mlp_kernel,
      out_shape=jax.ShapeDtypeStruct((m, d8), jnp.float32),
      grid=(1,),
      in_specs=[pl.BlockSpec(a.shape, lambda i: (0, 0)) for a in args],
      out_specs=pl.BlockSpec((m, d8), lambda i: (0, 0)),
  )(*args)


def _row_tiling(hw, batch, target=1024):
  """Row tile (= output lane dim): a multiple of 128, or the full extent when
  hw <= 128.  Returns (tile, padded_row_count); no monolithic fallback."""
  if hw <= 128:
    return hw, hw
  tm = min(target, (hw // 128) * 128)
  if batch * pl.cdiv(hw, tm) < 2:     # keep >= 2 parallel steps for v7x 2 TCs
    tm = max(128, ((hw // 2) // 128) * 128)
  return tm, pl.cdiv(hw, tm) * tm


def decode_fused(tokens, w1_mat, b1_row, g4_row, beta4_row, expand, wf_t,
                 bf_col, *, d4):
  """tokens: (b, hw, d) bf16; wf_t: (b, 16*n_cls, d) bf16;
  bf_col: (b, 16*n_cls, 1) f32  ->  scrambled seg (b, 16*n_cls, hw) f32."""
  b, hw, d = tokens.shape
  ncols = wf_t.shape[1]
  tm, hw_pad = _row_tiling(hw, b)
  if hw_pad != hw:
    tokens = jnp.pad(tokens, ((0, 0), (0, hw_pad - hw), (0, 0)))
  kern = functools.partial(_decode_fused_kernel, d4=d4)
  seg_scr = pl.pallas_call(
      kern,
      out_shape=jax.ShapeDtypeStruct((b, ncols, hw_pad), jnp.float32),
      grid=(b, hw_pad // tm),
      in_specs=[
          pl.BlockSpec((None, tm, d), lambda bi, ti: (bi, ti, 0)),
          pl.BlockSpec((d, d), lambda bi, ti: (0, 0)),
          pl.BlockSpec((1, d), lambda bi, ti: (0, 0)),
          pl.BlockSpec((1, d), lambda bi, ti: (0, 0)),
          pl.BlockSpec((1, d), lambda bi, ti: (0, 0)),
          pl.BlockSpec((4, d), lambda bi, ti: (0, 0)),
          pl.BlockSpec((None, ncols, d), lambda bi, ti: (bi, 0, 0)),
          pl.BlockSpec((None, ncols, 1), lambda bi, ti: (bi, 0, 0)),
      ],
      out_specs=pl.BlockSpec((None, ncols, tm), lambda bi, ti: (bi, 0, ti)),
      compiler_params=pltpu.CompilerParams(
          dimension_semantics=("parallel", "parallel")),
  )(tokens, w1_mat, b1_row, g4_row, beta4_row, expand, wf_t, bf_col)
  return seg_scr[:, :, :hw] if hw_pad != hw else seg_scr


# ----------------------------------------------------------------------------
# Module logic (glue in plain JAX)
# ----------------------------------------------------------------------------

def _transformer_stub(q_bdhw, image_pe, class_emb, emb_mask):
  # TODO(synk): `transformer` is an externally injected nn.Module (e.g. SAM's
  # TwoWayTransformer), not defined in this file; a deterministic single
  # cross-attention stand-in in plain JAX is used here.  It honors the shape
  # contract: returns (class embeddings (b,c,d), image tokens (b,h*w,d)).
  b, d, h, w = q_bdhw.shape
  tokens = (q_bdhw + image_pe).reshape(b, d, h * w).transpose(0, 2, 1)
  scale = 1.0 / jnp.sqrt(jnp.float32(d))
  logits = jnp.einsum("bcd,bkd->bck", class_emb, tokens) * scale
  attn = jax.nn.softmax(logits, axis=-1)
  class_out = class_emb + jnp.einsum("bck,bkd->bcd", attn, tokens)
  class_out = class_out * emb_mask[..., None].astype(class_out.dtype)
  return class_out, tokens


def prepare_decoder_params(params):
  """Hoist static weight layout/dtype prep out of the jitted forward path."""
  d = params["mlp_w1"].shape[0]
  d4, d8 = d // 4, d // 8
  prep = {k: params[k] for k in
          ("mlp_w1", "mlp_b1", "mlp_w2", "mlp_b2", "mlp_w3", "mlp_b3",
           "up2_b")}
  # up1 ConvT weight as a per-pixel GEMM matrix; group p = 2*kh1 + kw1.
  w1_mat = params["up1_w"].transpose(0, 2, 3, 1).reshape(d, 4 * d4)
  prep["w1_mat"] = w1_mat.astype(jnp.bfloat16)
  prep["b1_row"] = jnp.tile(params["up1_b"], 4).reshape(1, 4 * d4)
  prep["ln_g_row4"] = jnp.tile(params["ln_g"], 4).reshape(1, 4 * d4)
  prep["ln_b_row4"] = jnp.tile(params["ln_b"], 4).reshape(1, 4 * d4)
  # Group-indicator matrix for the in-kernel LayerNorm group reductions.
  col = jnp.arange(4 * d4)
  prep["ln_expand"] = (col[None, :] // d4 ==
                       jnp.arange(4)[:, None]).astype(jnp.float32)
  # up2 ConvT weight as (d4, sub-pixel q, d8); used for the per-batch fold.
  prep["w2_r"] = params["up2_w"].transpose(0, 2, 3, 1).reshape(d4, 4, d8)
  return prep


def _decode_pallas(prep, class_emb, tokens, h, w):
  """Upscaling + classification in scrambled pixel order (no HBM transposes
  until the final cheap unscramble of the c-channel seg tensor)."""
  b, hw, d = tokens.shape
  d4, d8 = d // 4, d // 8
  n_cls = class_emb.shape[1]

  # class_mlp on the (tiny) class embeddings.
  cls = class_mlp(class_emb.reshape(b * n_cls, d), prep).reshape(b, n_cls, d8)

  # Fold up2 + classify (no nonlinearity between them) into a per-batch
  # block-diagonal weight with K = d.  Fold computed in f32, cast to bf16.
  wf_small = jnp.einsum("dqe,bce->bdqc", prep["w2_r"], cls)       # (b,d4,4,c)
  wf_small = wf_small.reshape(b, d4, 4 * n_cls)
  eye4 = jnp.eye(4, dtype=wf_small.dtype)
  wf_big = jnp.einsum("pq,bdn->bpdqn", eye4, wf_small)            # blockdiag
  wf_big = wf_big.reshape(b, 4 * d4, 16 * n_cls)
  wf_t = wf_big.transpose(0, 2, 1).astype(jnp.bfloat16)           # (b,16c,d)
  bf_col = jnp.tile(jnp.einsum("bce,e->bc", cls, prep["up2_b"]),
                    (1, 16)).reshape(b, 16 * n_cls, 1)

  seg_scr = decode_fused(tokens.astype(jnp.bfloat16), prep["w1_mat"],
                         prep["b1_row"], prep["ln_g_row4"], prep["ln_b_row4"],
                         prep["ln_expand"], wf_t, bf_col, d4=d4)

  # Unscramble (b, 16*c, h*w) -> (b, c, 4h, 4w).  Group index g encodes
  # (kh1, kw1, kh2, kw2); output pixel = (4i + 2*kh1 + kh2, 4j + 2*kw1 + kw2).
  seg = seg_scr.reshape(b, 2, 2, 2, 2, n_cls, h, w)
  seg = seg.transpose(0, 5, 6, 1, 3, 7, 2, 4).reshape(b, n_cls, 4 * h, 4 * w)
  return seg


def mask_decoder_lam_forward(prep, query_embeddings, support_embeddings,
                             image_pe, pe_result, flag_examples):
  """query/support/image_pe: (b, d, h, w) NCHW; flag_examples: (b, n, c)."""
  del support_embeddings  # unused by the reference forward pass
  b, d, h, w = query_embeddings.shape

  # _get_pe_result (segment_example_logits=False)
  class_emb = pe_result["class_embs"]                               # (b,c,d)
  emb_mask = (flag_examples.sum(axis=1) > 0).astype(jnp.int32)      # (b,c)

  # transformer (injected module stand-in)
  class_emb, tokens = _transformer_stub(
      query_embeddings.astype(jnp.float32), image_pe.astype(jnp.float32),
      class_emb.astype(jnp.float32), emb_mask)

  # _upscale + _spatial_convs (None -> no-op) + _classify
  return _decode_pallas(prep, class_emb, tokens, h, w)


# ----------------------------------------------------------------------------
# Plain-JAX reference (independent layout path) for numeric cross-check
# ----------------------------------------------------------------------------

def _decode_reference(params, class_emb, tokens, h, w):
  b, hw, d = tokens.shape
  d4, d8 = d // 4, d // 8
  x = class_emb.reshape(-1, d)
  h1 = jax.nn.relu(x @ params["mlp_w1"] + params["mlp_b1"])
  h2 = jax.nn.relu(h1 @ params["mlp_w2"] + params["mlp_b2"])
  cls = (h2 @ params["mlp_w3"] + params["mlp_b3"]).reshape(b, -1, d8)

  w1m = params["up1_w"].transpose(0, 2, 3, 1).reshape(d, 4 * d4)
  y = tokens.reshape(b * hw, d) @ w1m + jnp.tile(params["up1_b"], 4)
  y = y.reshape(b, h, w, 2, 2, d4).transpose(0, 1, 3, 2, 4, 5)
  y = y.reshape(b, 2 * h, 2 * w, d4)
  mu = y.mean(-1, keepdims=True)
  var = ((y - mu) ** 2).mean(-1, keepdims=True)
  y = (y - mu) / jnp.sqrt(var + 1e-6) * params["ln_g"] + params["ln_b"]
  y = jax.nn.gelu(y, approximate=True)

  w2m = params["up2_w"].transpose(0, 2, 3, 1).reshape(d4, 4 * d8)
  u = y.reshape(b * 2 * h * 2 * w, d4) @ w2m + jnp.tile(params["up2_b"], 4)
  u = u.reshape(b, 2 * h, 2 * w, 2, 2, d8).transpose(0, 1, 3, 2, 4, 5)
  u = u.reshape(b, 4 * h, 4 * w, d8)
  return jnp.einsum("bcd,bHWd->bcHW", cls, u)


# ----------------------------------------------------------------------------
# Deterministic parameter init (shapes from the module's __init__)
# ----------------------------------------------------------------------------

def init_params(key, transformer_dim):
  d = transformer_dim
  d4, d8 = d // 4, d // 8
  ks = jax.random.split(key, 8)
  s = 0.1
  return dict(
      mlp_w1=jax.random.normal(ks[0], (d, d), jnp.float32) * s,
      mlp_b1=jnp.zeros((d,), jnp.float32),
      mlp_w2=jax.random.normal(ks[1], (d, d), jnp.float32) * s,
      mlp_b2=jnp.zeros((d,), jnp.float32),
      mlp_w3=jax.random.normal(ks[2], (d, d8), jnp.float32) * s,
      mlp_b3=jnp.zeros((d8,), jnp.float32),
      up1_w=jax.random.normal(ks[3], (d, d4, 2, 2), jnp.float32) * s,
      up1_b=jax.random.normal(ks[4], (d4,), jnp.float32) * s,
      ln_g=jnp.ones((d4,), jnp.float32),
      ln_b=jnp.zeros((d4,), jnp.float32),
      up2_w=jax.random.normal(ks[5], (d4, d8, 2, 2), jnp.float32) * s,
      up2_b=jax.random.normal(ks[6], (d8,), jnp.float32) * s,
  )


if __name__ == "__main__":
  key = jax.random.PRNGKey(0)
  b, d, h, w = 2, 32, 8, 8
  n_examples, n_classes = 2, 3

  keys = jax.random.split(key, 8)
  query = jax.random.normal(keys[0], (b, d, h, w), jnp.float32)
  support = jax.random.normal(keys[1], (b, d, h, w), jnp.float32)
  image_pe = jax.random.normal(keys[2], (b, d, h, w), jnp.float32)
  class_embs = jax.random.normal(keys[3], (b, n_classes, d), jnp.float32)
  flag_examples = (jax.random.uniform(keys[4], (b, n_examples, n_classes))
                   > 0.3).astype(jnp.int32)
  pe_result = {"class_embs": class_embs}
  params = init_params(keys[5], d)
  prep = prepare_decoder_params(params)       # hoisted out of the forward jit

  fwd = jax.jit(mask_decoder_lam_forward)
  seg = fwd(prep, query, support, image_pe, pe_result, flag_examples)
  seg = jax.block_until_ready(seg)
  assert seg.shape == (b, n_classes, 4 * h, 4 * w), seg.shape
  assert bool(jnp.all(jnp.isfinite(seg)))

  # Numeric cross-check vs an f32 plain-JAX reference (Pallas path uses bf16
  # matmul operands with f32 accumulation, so tolerance is loose-ish).
  emb_mask = (flag_examples.sum(axis=1) > 0).astype(jnp.int32)
  ce, toks = _transformer_stub(query, image_pe, class_embs, emb_mask)
  seg_ref = _decode_reference(params, ce, toks, h, w)
  err = float(jnp.max(jnp.abs(seg - seg_ref)))
  assert err < 5e-2, f"max abs err {err}"

  print("KERNEL_OK")
</pallas_src>

<mosaic_0001>
module attributes {stable_mosaic.version = 11 : i64} {
  func.func @_class_mlp_kernel(%arg0: i32, %arg1: memref<6x32xf32, #tpu.memory_space<vmem>>, %arg2: memref<32x32xf32, #tpu.memory_space<vmem>>, %arg3: memref<1x32xf32, #tpu.memory_space<vmem>>, %arg4: memref<32x32xf32, #tpu.memory_space<vmem>>, %arg5: memref<1x32xf32, #tpu.memory_space<vmem>>, %arg6: memref<32x4xf32, #tpu.memory_space<vmem>>, %arg7: memref<1x4xf32, #tpu.memory_space<vmem>>, %arg8: memref<6x4xf32, #tpu.memory_space<vmem>>) attributes {dimension_semantics = [#tpu.dimension_semantics<arbitrary>], iteration_bounds = array<i64: 1>, scalar_prefetch = 0 : i64, scratch_operands = 0 : i64, tpu.core_type = #tpu.core_type<tc>, window_params = [{pipeline_mode = #tpu.pipeline_mode<synchronous>, transform_indices = @transform_0, window_bounds = array<i64: 6, 32>}, {pipeline_mode = #tpu.pipeline_mode<synchronous>, transform_indices = @transform_1, window_bounds = array<i64: 32, 32>}, {pipeline_mode = #tpu.pipeline_mode<synchronous>, transform_indices = @transform_2, window_bounds = array<i64: 1, 32>}, {pipeline_mode = #tpu.pipeline_mode<synchronous>, transform_indices = @transform_3, window_bounds = array<i64: 32, 32>}, {pipeline_mode = #tpu.pipeline_mode<synchronous>, transform_indices = @transform_4, window_bounds = array<i64: 1, 32>}, {pipeline_mode = #tpu.pipeline_mode<synchronous>, transform_indices = @transform_5, window_bounds = array<i64: 32, 4>}, {pipeline_mode = #tpu.pipeline_mode<synchronous>, transform_indices = @transform_6, window_bounds = array<i64: 1, 4>}, {pipeline_mode = #tpu.pipeline_mode<synchronous>, transform_indices = @transform_7, window_bounds = array<i64: 6, 4>}]} {
    %c0 = arith.constant 0 : index
    %c0_0 = arith.constant 0 : index
    %0 = vector.load %arg1[%c0, %c0_0] : memref<6x32xf32, #tpu.memory_space<vmem>>, vector<6x32xf32>
    %c0_1 = arith.constant 0 : index
    %c0_2 = arith.constant 0 : index
    %1 = vector.load %arg2[%c0_1, %c0_2] : memref<32x32xf32, #tpu.memory_space<vmem>>, vector<32x32xf32>
    %cst = arith.constant dense<0.000000e+00> : vector<6x32xf32>
    %2 = tpu.matmul %0, %1, %cst {dimension_numbers = #tpu.dot_dimension_numbers<[1], [0], [0], [1], [0, 0, 1, 1], [], []>} : vector<6x32xf32>, vector<32x32xf32>, vector<6x32xf32> -> vector<6x32xf32>
    %c0_3 = arith.constant 0 : index
    %c0_4 = arith.constant 0 : index
    %3 = vector.load %arg3[%c0_3, %c0_4] : memref<1x32xf32, #tpu.memory_space<vmem>>, vector<1x32xf32>
    %4 = vector.broadcast %3 : vector<1x32xf32> to vector<6x32xf32>
    %5 = arith.addf %2, %4 : vector<6x32xf32>
    %cst_5 = arith.constant 0.000000e+00 : f32
    %6 = vector.broadcast %cst_5 : f32 to vector<6x32xf32>
    %7 = arith.maximumf %5, %6 : vector<6x32xf32>
    %c0_6 = arith.constant 0 : index
    %c0_7 = arith.constant 0 : index
    %8 = vector.load %arg4[%c0_6, %c0_7] : memref<32x32xf32, #tpu.memory_space<vmem>>, vector<32x32xf32>
    %cst_8 = arith.constant dense<0.000000e+00> : vector<6x32xf32>
    %9 = tpu.matmul %7, %8, %cst_8 {dimension_numbers = #tpu.dot_dimension_numbers<[1], [0], [0], [1], [0, 0, 1, 1], [], []>} : vector<6x32xf32>, vector<32x32xf32>, vector<6x32xf32> -> vector<6x32xf32>
    %c0_9 = arith.constant 0 : index
    %c0_10 = arith.constant 0 : index
    %10 = vector.load %arg5[%c0_9, %c0_10] : memref<1x32xf32, #tpu.memory_space<vmem>>, vector<1x32xf32>
    %11 = vector.broadcast %10 : vector<1x32xf32> to vector<6x32xf32>
    %12 = arith.addf %9, %11 : vector<6x32xf32>
    %cst_11 = arith.constant 0.000000e+00 : f32
    %13 = vector.broadcast %cst_11 : f32 to vector<6x32xf32>
    %14 = arith.maximumf %12, %13 : vector<6x32xf32>
    %c0_12 = arith.constant 0 : index
    %c0_13 = arith.constant 0 : index
    %15 = vector.load %arg6[%c0_12, %c0_13] : memref<32x4xf32, #tpu.memory_space<vmem>>, vector<32x4xf32>
    %cst_14 = arith.constant dense<0.000000e+00> : vector<6x4xf32>
    %16 = tpu.matmul %14, %15, %cst_14 {dimension_numbers = #tpu.dot_dimension_numbers<[1], [0], [0], [1], [0, 0, 1, 1], [], []>} : vector<6x32xf32>, vector<32x4xf32>, vector<6x4xf32> -> vector<6x4xf32>
    %c0_15 = arith.constant 0 : index
    %c0_16 = arith.constant 0 : index
    %17 = vector.load %arg7[%c0_15, %c0_16] : memref<1x4xf32, #tpu.memory_space<vmem>>, vector<1x4xf32>
    %18 = vector.broadcast %17 : vector<1x4xf32> to vector<6x4xf32>
    %19 = arith.addf %16, %18 : vector<6x4xf32>
    %c0_17 = arith.constant 0 : index
    %c0_18 = arith.constant 0 : index
    %20 = vector.load %arg8[%c0_17, %c0_18] : memref<6x4xf32, #tpu.memory_space<vmem>>, vector<6x4xf32>
    tpu.vector_store %arg8[%c0_17, %c0_18], %19 {strides = array<i32>} : memref<6x4xf32, #tpu.memory_space<vmem>>, vector<6x4xf32>,
    return
  }
  func.func @transform_0(%arg0: i32) -> (i32, i32) {
    %c0_i32 = arith.constant 0 : i32
    %c0_i32_0 = arith.constant 0 : i32
    %c0_i32_1 = arith.constant 0 : i32
    return %c0_i32, %c0_i32_0 : i32, i32
  }
  func.func @transform_1(%arg0: i32) -> (i32, i32) {
    %c0_i32 = arith.constant 0 : i32
    %c0_i32_0 = arith.constant 0 : i32
    %c0_i32_1 = arith.constant 0 : i32
    return %c0_i32, %c0_i32_0 : i32, i32
  }
  func.func @transform_2(%arg0: i32) -> (i32, i32) {
    %c0_i32 = arith.constant 0 : i32
    %c0_i32_0 = arith.constant 0 : i32
    %c0_i32_1 = arith.constant 0 : i32
    return %c0_i32, %c0_i32_0 : i32, i32
  }
  func.func @transform_3(%arg0: i32) -> (i32, i32) {
    %c0_i32 = arith.constant 0 : i32
    %c0_i32_0 = arith.constant 0 : i32
    %c0_i32_1 = arith.constant 0 : i32
    return %c0_i32, %c0_i32_0 : i32, i32
  }
  func.func @transform_4(%arg0: i32) -> (i32, i32) {
    %c0_i32 = arith.constant 0 : i32
    %c0_i32_0 = arith.constant 0 : i32
    %c0_i32_1 = arith.constant 0 : i32
    return %c0_i32, %c0_i32_0 : i32, i32
  }
  func.func @transform_5(%arg0: i32) -> (i32, i32) {
    %c0_i32 = arith.constant 0 : i32
    %c0_i32_0 = arith.constant 0 : i32
    %c0_i32_1 = arith.constant 0 : i32
    return %c0_i32, %c0_i32_0 : i32, i32
  }
  func.func @transform_6(%arg0: i32) -> (i32, i32) {
    %c0_i32 = arith.constant 0 : i32
    %c0_i32_0 = arith.constant 0 : i32
    %c0_i32_1 = arith.constant 0 : i32
    return %c0_i32, %c0_i32_0 : i32, i32
  }
  func.func @transform_7(%arg0: i32) -> (i32, i32) {
    %c0_i32 = arith.constant 0 : i32
    %c0_i32_0 = arith.constant 0 : i32
    %c0_i32_1 = arith.constant 0 : i32
    return %c0_i32, %c0_i32_0 : i32, i32
  }
}

module attributes {stable_mosaic.version = 11 : i64} {
  func.func @_decode_fused_kernel(%arg0: i32, %arg1: i32, %arg2: memref<1x64x32xbf16, #tpu.memory_space<vmem>>, %arg3: memref<32x32xbf16, #tpu.memory_space<vmem>>, %arg4: memref<1x32xf32, #tpu.memory_space<vmem>>, %arg5: memref<1x32xf32, #tpu.memory_space<vmem>>, %arg6: memref<1x32xf32, #tpu.memory_space<vmem>>, %arg7: memref<4x32xf32, #tpu.memory_space<vmem>>, %arg8: memref<1x48x32xbf16, #tpu.memory_space<vmem>>, %arg9: memref<1x48x1xf32, #tpu.memory_space<vmem>>, %arg10: memref<1x48x64xf32, #tpu.memory_space<vmem>>) attributes {dimension_semantics = [#tpu.dimension_semantics<parallel>, #tpu.dimension_semantics<parallel>], iteration_bounds = array<i64: 2, 1>, scalar_prefetch = 0 : i64, scratch_operands = 0 : i64, tpu.core_type = #tpu.core_type<tc>, window_params = [{transform_indices = @transform_0, window_bounds = array<i64: 1, 64, 32>}, {pipeline_mode = #tpu.pipeline_mode<synchronous>, transform_indices = @transform_1, window_bounds = array<i64: 32, 32>}, {pipeline_mode = #tpu.pipeline_mode<synchronous>, transform_indices = @transform_2, window_bounds = array<i64: 1, 32>}, {pipeline_mode = #tpu.pipeline_mode<synchronous>, transform_indices = @transform_3, window_bounds = array<i64: 1, 32>}, {pipeline_mode = #tpu.pipeline_mode<synchronous>, transform_indices = @transform_4, window_bounds = array<i64: 1, 32>}, {pipeline_mode = #tpu.pipeline_mode<synchronous>, transform_indices = @transform_5, window_bounds = array<i64: 4, 32>}, {transform_indices = @transform_6, window_bounds = array<i64: 1, 48, 32>}, {transform_indices = @transform_7, window_bounds = array<i64: 1, 48, 1>}, {transform_indices = @transform_8, window_bounds = array<i64: 1, 48, 64>}]} {
    %c0 = arith.constant 0 : index
    %c0_0 = arith.constant 0 : index
    %c0_1 = arith.constant 0 : index
    %0 = vector.load %arg2[%c0, %c0_0, %c0_1] : memref<1x64x32xbf16, #tpu.memory_space<vmem>>, vector<1x64x32xbf16>
    %1 = vector.shape_cast %0 : vector<1x64x32xbf16> to vector<64x32xbf16>
    %c0_2 = arith.constant 0 : index
    %c0_3 = arith.constant 0 : index
    %2 = vector.load %arg3[%c0_2, %c0_3] : memref<32x32xbf16, #tpu.memory_space<vmem>>, vector<32x32xbf16>
    %cst = arith.constant dense<0.000000e+00> : vector<64x32xf32>
    %3 = tpu.matmul %1, %2, %cst {dimension_numbers = #tpu.dot_dimension_numbers<[1], [0], [0], [1], [0, 0, 1, 1], [], []>} : vector<64x32xbf16>, vector<32x32xbf16>, vector<64x32xf32> -> vector<64x32xf32>
    %c0_4 = arith.constant 0 : index
    %c0_5 = arith.constant 0 : index
    %4 = vector.load %arg4[%c0_4, %c0_5] : memref<1x32xf32, #tpu.memory_space<vmem>>, vector<1x32xf32>
    %5 = vector.broadcast %4 : vector<1x32xf32> to vector<64x32xf32>
    %6 = arith.addf %3, %5 : vector<64x32xf32>
    %c0_6 = arith.constant 0 : index
    %c0_7 = arith.constant 0 : index
    %7 = vector.load %arg7[%c0_6, %c0_7] : memref<4x32xf32, #tpu.memory_space<vmem>>, vector<4x32xf32>
    %cst_8 = arith.constant dense<0.000000e+00> : vector<64x4xf32>
    %8 = tpu.matmul %6, %7, %cst_8 {dimension_numbers = #tpu.dot_dimension_numbers<[1], [1], [0], [0], [0, 0, 1, 0], [], []>} : vector<64x32xf32>, vector<4x32xf32>, vector<64x4xf32> -> vector<64x4xf32>
    %cst_9 = arith.constant 1.250000e-01 : f32
    %9 = vector.broadcast %cst_9 : f32 to vector<64x4xf32>
    %10 = arith.mulf %8, %9 : vector<64x4xf32>
    %11 = arith.mulf %6, %6 : vector<64x32xf32>
    %cst_10 = arith.constant dense<0.000000e+00> : vector<64x4xf32>
    %12 = tpu.matmul %11, %7, %cst_10 {dimension_numbers = #tpu.dot_dimension_numbers<[1], [1], [0], [0], [0, 0, 1, 0], [], []>} : vector<64x32xf32>, vector<4x32xf32>, vector<64x4xf32> -> vector<64x4xf32>
    %cst_11 = arith.constant 1.250000e-01 : f32
    %13 = vector.broadcast %cst_11 : f32 to vector<64x4xf32>
    %14 = arith.mulf %12, %13 : vector<64x4xf32>
    %15 = arith.mulf %10, %10 : vector<64x4xf32>
    %16 = arith.subf %14, %15 : vector<64x4xf32>
    %cst_12 = arith.constant 9.99999997E-7 : f32
    %17 = vector.broadcast %cst_12 : f32 to vector<64x4xf32>
    %18 = arith.addf %16, %17 : vector<64x4xf32>
    %19 = math.rsqrt %18 : vector<64x4xf32>
    %cst_13 = arith.constant dense<0.000000e+00> : vector<64x32xf32>
    %20 = tpu.matmul %10, %7, %cst_13 {dimension_numbers = #tpu.dot_dimension_numbers<[1], [0], [0], [1], [0, 0, 1, 1], [], []>} : vector<64x4xf32>, vector<4x32xf32>, vector<64x32xf32> -> vector<64x32xf32>
    %cst_14 = arith.constant dense<0.000000e+00> : vector<64x32xf32>
    %21 = tpu.matmul %19, %7, %cst_14 {dimension_numbers = #tpu.dot_dimension_numbers<[1], [0], [0], [1], [0, 0, 1, 1], [], []>} : vector<64x4xf32>, vector<4x32xf32>, vector<64x32xf32> -> vector<64x32xf32>
    %22 = arith.subf %6, %20 : vector<64x32xf32>
    %c0_15 = arith.constant 0 : index
    %c0_16 = arith.constant 0 : index
    %23 = vector.load %arg5[%c0_15, %c0_16] : memref<1x32xf32, #tpu.memory_space<vmem>>, vector<1x32xf32>
    %24 = vector.broadcast %23 : vector<1x32xf32> to vector<64x32xf32>
    %25 = arith.mulf %21, %24 : vector<64x32xf32>
    %26 = arith.mulf %22, %25 : vector<64x32xf32>
    %c0_17 = arith.constant 0 : index
    %c0_18 = arith.constant 0 : index
    %27 = vector.load %arg6[%c0_17, %c0_18] : memref<1x32xf32, #tpu.memory_space<vmem>>, vector<1x32xf32>
    %28 = vector.broadcast %27 : vector<1x32xf32> to vector<64x32xf32>
    %29 = arith.addf %26, %28 : vector<64x32xf32>
    %30 = arith.mulf %29, %29 : vector<64x32xf32>
    %31 = arith.mulf %29, %30 : vector<64x32xf32>
    %cst_19 = arith.constant 4.471500e-02 : f32
    %32 = vector.broadcast %cst_19 : f32 to vector<64x32xf32>
    %33 = arith.mulf %32, %31 : vector<64x32xf32>
    %34 = arith.addf %29, %33 : vector<64x32xf32>
    %cst_20 = arith.constant 0.797884583 : f32
    %35 = vector.broadcast %cst_20 : f32 to vector<64x32xf32>
    %36 = arith.mulf %35, %34 : vector<64x32xf32>
    %37 = math.tanh %36 : vector<64x32xf32>
    %cst_21 = arith.constant 1.000000e+00 : f32
    %38 = vector.broadcast %cst_21 : f32 to vector<64x32xf32>
    %39 = arith.addf %38, %37 : vector<64x32xf32>
    %cst_22 = arith.constant 5.000000e-01 : f32
    %40 = vector.broadcast %cst_22 : f32 to vector<64x32xf32>
    %41 = arith.mulf %40, %39 : vector<64x32xf32>
    %42 = arith.mulf %29, %41 : vector<64x32xf32>
    %43 = arith.truncf %42 : vector<64x32xf32> to vector<64x32xbf16>
    %c0_23 = arith.constant 0 : index
    %c0_24 = arith.constant 0 : index
    %c0_25 = arith.constant 0 : index
    %44 = vector.load %arg8[%c0_23, %c0_24, %c0_25] : memref<1x48x32xbf16, #tpu.memory_space<vmem>>, vector<1x48x32xbf16>
    %45 = vector.shape_cast %44 : vector<1x48x32xbf16> to vector<48x32xbf16>
    %cst_26 = arith.constant dense<0.000000e+00> : vector<48x64xf32>
    %46 = tpu.matmul %45, %43, %cst_26 {dimension_numbers = #tpu.dot_dimension_numbers<[1], [1], [0], [0], [0, 0, 1, 0], [], []>} : vector<48x32xbf16>, vector<64x32xbf16>, vector<48x64xf32> -> vector<48x64xf32>
    %c0_27 = arith.constant 0 : index
    %c0_28 = arith.constant 0 : index
    %c0_29 = arith.constant 0 : index
    %47 = vector.load %arg9[%c0_27, %c0_28, %c0_29] : memref<1x48x1xf32, #tpu.memory_space<vmem>>, vector<1x48x1xf32>
    %48 = vector.shape_cast %47 : vector<1x48x1xf32> to vector<48x1xf32>
    %49 = vector.broadcast %48 : vector<48x1xf32> to vector<48x64xf32>
    %50 = arith.addf %46, %49 : vector<48x64xf32>
    %c0_30 = arith.constant 0 : index
    %c0_31 = arith.constant 0 : index
    %c0_32 = arith.constant 0 : index
    %51 = vector.load %arg10[%c0_30, %c0_31, %c0_32] : memref<1x48x64xf32, #tpu.memory_space<vmem>>, vector<1x48x64xf32>
    %52 = vector.shape_cast %51 : vector<1x48x64xf32> to vector<48x64xf32>
    %53 = vector.shape_cast %50 : vector<48x64xf32> to vector<1x48x64xf32>
    tpu.vector_store %arg10[%c0_30, %c0_31, %c0_32], %53 {strides = array<i32>} : memref<1x48x64xf32, #tpu.memory_space<vmem>>, vector<1x48x64xf32>,
    return
  }
  func.func @transform_0(%arg0: i32, %arg1: i32) -> (i32, i32, i32) {
    %c0_i32 = arith.constant 0 : i32
    %c0_i32_0 = arith.constant 0 : i32
    return %arg0, %arg1, %c0_i32 : i32, i32, i32
  }
  func.func @transform_1(%arg0: i32, %arg1: i32) -> (i32, i32) {
    %c0_i32 = arith.constant 0 : i32
    %c0_i32_0 = arith.constant 0 : i32
    %c0_i32_1 = arith.constant 0 : i32
    return %c0_i32, %c0_i32_0 : i32, i32
  }
  func.func @transform_2(%arg0: i32, %arg1: i32) -> (i32, i32) {
    %c0_i32 = arith.constant 0 : i32
    %c0_i32_0 = arith.constant 0 : i32
    %c0_i32_1 = arith.constant 0 : i32
    return %c0_i32, %c0_i32_0 : i32, i32
  }
  func.func @transform_3(%arg0: i32, %arg1: i32) -> (i32, i32) {
    %c0_i32 = arith.constant 0 : i32
    %c0_i32_0 = arith.constant 0 : i32
    %c0_i32_1 = arith.constant 0 : i32
    return %c0_i32, %c0_i32_0 : i32, i32
  }
  func.func @transform_4(%arg0: i32, %arg1: i32) -> (i32, i32) {
    %c0_i32 = arith.constant 0 : i32
    %c0_i32_0 = arith.constant 0 : i32
    %c0_i32_1 = arith.constant 0 : i32
    return %c0_i32, %c0_i32_0 : i32, i32
  }
  func.func @transform_5(%arg0: i32, %arg1: i32) -> (i32, i32) {
    %c0_i32 = arith.constant 0 : i32
    %c0_i32_0 = arith.constant 0 : i32
    %c0_i32_1 = arith.constant 0 : i32
    return %c0_i32, %c0_i32_0 : i32, i32
  }
  func.func @transform_6(%arg0: i32, %arg1: i32) -> (i32, i32, i32) {
    %c0_i32 = arith.constant 0 : i32
    %c0_i32_0 = arith.constant 0 : i32
    %c0_i32_1 = arith.constant 0 : i32
    return %arg0, %c0_i32, %c0_i32_0 : i32, i32, i32
  }
  func.func @transform_7(%arg0: i32, %arg1: i32) -> (i32, i32, i32) {
    %c0_i32 = arith.constant 0 : i32
    %c0_i32_0 = arith.constant 0 : i32
    %c0_i32_1 = arith.constant 0 : i32
    return %arg0, %c0_i32, %c0_i32_0 : i32, i32, i32
  }
  func.func @transform_8(%arg0: i32, %arg1: i32) -> (i32, i32, i32) {
    %c0_i32 = arith.constant 0 : i32
    %c0_i32_0 = arith.constant 0 : i32
    return %arg0, %c0_i32, %arg1 : i32, i32, i32
  }
}

</mosaic_0001>

<bundles_post_ra>
// kernel: mask_decoder_lam_forward.2
= control target key start
LH: loop header
LB: loop body
LE: loop exit
PB: predicated region body
PF: predicated region fallthrough
CT: control target
= control target key end

     0   :  { %12 = vsyncpa [#allocation3], 0  ;;  %s426_s0 = inlined_call_operand.vmem [shape: f32[6,32], index: 0, kind: input, shape index: {}]   ;;  %s427_s1 = inlined_call_operand.hbm [shape: f32[32,32], index: 1, kind: input, shape index: {}]   ;;  %s428_s2 = inlined_call_operand.hbm [shape: f32[1,32], index: 2, kind: input, shape index: {}]   ;;  %s429_s3 = inlined_call_operand.hbm [shape: f32[32,32], index: 3, kind: input, shape index: {}]   ;;  %s430_s4 = inlined_call_operand.hbm [shape: f32[1,32], index: 4, kind: input, shape index: {}]   ;;  %s431_s5 = inlined_call_operand.vmem [shape: f32[32,4], index: 5, kind: input, shape index: {}]   ;;  %s432_s6 = inlined_call_operand.hbm [shape: f32[1,4], index: 6, kind: input, shape index: {}]   ;;  %s433_s7 = inlined_call_operand.vmem [shape: f32[6,4], index: 7, kind: output, shape index: {}]  }
   0x1   :  { %13 = vsyncpa [#allocation5], 0  ;;  %s35_s26 = sshll.u32 %s428_s2, 4  ;;  %s36_s26 = int_to_ptr.hbm [resolvable:$true] %s35_s26 }
   0x2   :  { %14 = vsyncpa [#allocation8], 0  ;;  %s343_s27 = smov [#allocation4]   ;;  %s59_s8 = sshll.u32 %s430_s4, 4  ;;  %s60_s8 = int_to_ptr.hbm [resolvable:$true] %s59_s8 }
   0x3   :  { %s37_s28 = sshll.u32 %s343_s27, 4  ;;  %s344_s9 = smov [#allocation7]   ;;  %s38_s28 = int_to_ptr.vmem [resolvable:$true] %s37_s28 }
   0x4   :  { %40 = dma.hbm_to_vmem [thread:$0]  %s36_s26, 16, %s38_s28, [#allocation5]  }
   0x5   :  { %s61_s10 = sshll.u32 %s344_s9, 4  ;;  %s21_s13 = sshll.u32 %s427_s1, 4  ;;  %s62_s10 = int_to_ptr.vmem [resolvable:$true] %s61_s10  ;;  %s22_s13 = int_to_ptr.hbm [resolvable:$true] %s21_s13 }
   0x6   :  { %64 = dma.hbm_to_vmem [thread:$0]  %s60_s8, 16, %s62_s10, [#allocation8]  }
   0x7   :  { %s345_s2 = smov [#allocation2]   ;;  %s45_s17 = sshll.u32 %s429_s3, 4  ;;  %s46_s17 = int_to_ptr.hbm [resolvable:$true] %s45_s17 }
   0x8   :  { %s23_s14 = sshll.u32 %s345_s2, 4  ;;  %s346_s18 = smov 128   ;;  %s24_s14 = int_to_ptr.vmem [resolvable:$true] %s23_s14 }
   0x9   :  { %s347_s4 = smov 8   ;;  %s348_s19 = smov [#allocation6]  }
   0xa   :  { %29 = dma.hbm_to_vmem [thread:$0]  %s22_s13, 512, %s24_s14, [#allocation3], %s346_s18, %s346_s18, %s347_s4  }
   0xb   :  { %s47_s20 = sshll.u32 %s348_s19, 4  ;;  %s72_s1 = sshll.u32 %s432_s6, 4  ;;  %s48_s20 = int_to_ptr.vmem [resolvable:$true] %s47_s20  ;;  %s73_s1 = int_to_ptr.hbm [resolvable:$true] %s72_s1 }
   0xc   :  { %53 = dma.hbm_to_vmem [thread:$0]  %s46_s17, 512, %s48_s20, [#allocation5], %s346_s18, %s346_s18, %s347_s4  }
   0xd   :  { %s349_s23 = smov [#allocation9]  }
   0xe   :  { %s74_s24 = sshll.u32 %s349_s23, 4  ;;  %s75_s24 = int_to_ptr.vmem [resolvable:$true] %s74_s24 }
   0xf   :  { %77 = dma.hbm_to_vmem [thread:$0]  %s73_s1, 16, %s75_s24, [#allocation8]  }
  0x10   :  { %337 = dma.done.wait [#allocation3], 512  }
  0x11   :  { %338 = vsyncadd [#allocation3], 4294966784 }
  0x12   :  { %339 = dma.done.wait [#allocation5], 528  }
  0x13   :  { %340 = vsyncadd [#allocation5], 4294966768 }
  0x14   :  { %341 = dma.done.wait [#allocation8], 32  }
  0x15   :  { %342 = vsyncadd [#allocation8], 4294967264  ;;  %v102_v0 = vld [vmem:[#allocation2 + $0x18] sm:$0xff]  ;;  %v101_v1 = vld [vmem:[#allocation2 + $0x10] sm:$0xff]  ;;  %vm107_vm0 = vcmask 261120   ;;  %vm195_vm1 = vcmask 29696  }
  0x16   :  { %123 = vmatpush.msra.mxu0 %v102_v0  ;;  %v135_v2 = vld [vmem:[#allocation6 + $0x18] sm:$0xff]  ;;  %v100_v3 = vld [vmem:[#allocation2 + $0x8] sm:$0xff]  ;;  %v134_v6 = vld [vmem:[#allocation6 + $0x10] sm:$0xff] }
  0x17   :  { %155 = vmatpush.msra.mxu1 %v135_v2  ;;  %v99_v4 = vld [vmem:[#allocation2] sm:$0xff]  ;;  %v133_v7 = vld [vmem:[#allocation6 + $0x8] sm:$0xff]  ;;  %v167_v9 = vld [vmem:[%s431_s5 + $0x18] sm:$0xff] }
  0x18   :  { %124 = vmatpush.msra.mxu0 %v101_v1  ;;  %v98_v5 = vld [vmem:[%s426_s0] sm:$0x3f]  ;;  %187 = vmatpush.msra.mxu2 %v167_v9  ;;  %v166_v14 = vld [vmem:[%s431_s5 + $0x10] sm:$0xff]  ;;  %v165_v15 = vld [vmem:[%s431_s5 + $0x8] sm:$0xff] }
  0x19   :  { %156 = vmatpush.msra.mxu1 %v134_v6  ;;  %v132_v8 = vld [vmem:[#allocation6] sm:$0xff]  ;;  %v214_v10 = vld [vmem:[#allocation4] ss:$0 sm:$0xff] }
  0x1a   :  { %125 = vmatpush.msra.mxu0 %v100_v3  ;;  %188 = vmatpush.msra.mxu2 %v166_v14  ;;  %v164_v16 = vld [vmem:[%s431_s5] sm:$0xff] }
  0x1b   :  { %157 = vmatpush.msra.mxu1 %v133_v7  ;;  %v215_v17 = vld [vmem:[#allocation7] ss:$0 sm:$0xff]  ;;  %v216_v21 = vld [vmem:[#allocation9] ss:$0 sm:$0xff] }
  0x1c   :  { %126 = vmatpush.msra.mxu0 %v99_v4  ;;  %189 = vmatpush.msra.mxu2 %v165_v15 }
  0x1d   :  { %204 = vmatmul.msk.f32.vlgmr.msra.gmra.mxu0 %vm107_vm0, %v98_v5  ;;  %158 = vmatpush.msra.mxu1 %v132_v8 }
  0x1e   :  { %190 = vmatpush.msra.mxu2 %v164_v16 }
  0x9a   :  { %v128_v11 = vpop.f32.mrf.mxu0 }
  0x9b   :  { %v129_v12 = vadd.f32 %v214_v10, %v128_v11 }
  0x9d   :  { %v131_v13 = vmax.f32 %v129_v12, 0.0 }
  0x9f   :  { %205 = vmatmul.msk.f32.vlgmr.msra.gmra.mxu1 %vm107_vm0, %v131_v13 }
 0x11c   :  { %v160_v18 = vpop.f32.mrf.mxu1 }
 0x11d   :  { %v161_v19 = vadd.f32 %v215_v17, %v160_v18 }
 0x11f   :  { %v163_v20 = vmax.f32 %v161_v19, 0.0 }
 0x121   :  { %206 = vmatmul.msk.f32.vlgmr.msra.gmra.mxu2 %vm107_vm0, %v163_v20 }
 0x1a4   :  { %v192_v22 = vpop.f32.mrf.mxu2 }
 0x1a5   :  { %v193_v23 = vadd.f32 %v216_v21, %v192_v22 }
 0x1a7   :  { %196 = vst.msk [vmem:[%s433_s7] sm:$0x3f] %vm195_vm1, %v193_v23 }
 0x1a8   :  { %201 = vsyncpa [#allocation3], 1 }
 0x1a9   :  { %202 = vsyncpa [#allocation5], 1 }
 0x1aa   :  { %203 = vsyncpa [#allocation8], 1 }

// kernel: mask_decoder_lam_forward.3
= control target key start
LH: loop header
LB: loop body
LE: loop exit
PB: predicated region body
PF: predicated region fallthrough
CT: control target
= control target key end

     0   :  { %13 = vsyncpa [#allocation3], 0  ;;  %s2077_s0 = inlined_call_operand.vmem [shape: bf16[2,64,32], index: 0, kind: input, shape index: {}]   ;;  %s2078_s1 = inlined_call_operand.hbm [shape: bf16[32,32], index: 1, kind: input, shape index: {}]   ;;  %s2079_s2 = inlined_call_operand.hbm [shape: f32[1,32], index: 2, kind: input, shape index: {}]   ;;  %s2080_s3 = inlined_call_operand.hbm [shape: f32[1,32], index: 3, kind: input, shape index: {}]   ;;  %s2081_s4 = inlined_call_operand.hbm [shape: f32[1,32], index: 4, kind: input, shape index: {}]   ;;  %s2082_s5 = inlined_call_operand.hbm [shape: f32[4,32], index: 5, kind: input, shape index: {}]   ;;  %s2083_s6 = inlined_call_operand.vmem [shape: bf16[2,48,32], index: 6, kind: input, shape index: {}]   ;;  %s2084_s7 = inlined_call_operand.vmem [shape: f32[2,48,1], index: 7, kind: input, shape index: {}]   ;;  %s2085_s8 = inlined_call_operand.vmem [shape: f32[2,48,64], index: 8, kind: output, shape index: {}]  }
   0x1   :  { %14 = vsyncpa [#allocation5], 0 }
   0x2   :  { %15 = vsyncpa [#allocation8], 0  ;;  %s1797_s27 = smov 0   ;;  %s1799_s28 = smov 0  }
   0x3   :  { %s1801_s29 = smov 0  }
   0x4 LB: > { %s277_s10 = sshll.u32 %s2079_s2, 4  ;;  %s1327_s11 = sadd.s32 4294967295, %s1742_s29   ;;  %s1742_s29 = sphi %s1801_s29, %s21_s29   ;;  %s1738_s28 = sphi %s1799_s28, %s2090_s28   ;;  %s1734_s27 = sphi %s1797_s27, %s2089_s27   ;;  %s278_s10 = int_to_ptr.hbm [resolvable:$true] %s277_s10 }
   0x5   : > { %p1329_p0 = scmp.ge.s32.totalorder %s1742_s29, 1  ;;  %p251_p1 = scmp.lt.s32.totalorder %s1742_s29, 3 }
   0x6   : > { %p1818_p2 = scmp.eq.s32.totalorder %s1327_s11, 0  ;;  %s1744_s14 = smov [#allocation4]  }
   0x7   : > { %p1822_p3 = pnand %p1329_p0, %p251_p1  ;;  %s279_s15 = sshll.u32 %s1744_s14, 4  ;;  %s280_s15 = int_to_ptr.vmem [resolvable:$true] %s279_s15 }
   0x8   : > { %s301_s18 = sshll.u32 %s2081_s4, 4  ;;  %s1745_s20 = smov [#allocation7]   ;;  %s302_s18 = int_to_ptr.hbm [resolvable:$true] %s301_s18 }
   0x9   : > { %p1462_p4 = pneg %p1822_p3  ;;  %s303_s21 = sshll.u32 %s1745_s20, 4  ;;  %s304_s21 = int_to_ptr.vmem [resolvable:$true] %s303_s21 }
   0xa   : > { %s33_s22 = sadd.s32 1, %s1738_s28  ;;  %s262_s25 = sshll.u32 %s2078_s1, 4  ;;  %s263_s25 = int_to_ptr.hbm [resolvable:$true] %s262_s25 }
   0xb   : > { %p1833_p5 = pnand %p1818_p2, %p1462_p4  ;;  %p35_p6 = scmp.ge.s32.totalorder %s33_s22, 2 }
   0xc   : > { %s1746_s26 = smov [#allocation2]   ;;  %s1747_s9 = smov 64  }
   0xd   : > { %1468 = dma.hbm_to_vmem [thread:$0]  (!%p1833_p5), %s278_s10, 16, %s280_s15, [#allocation5]  }
   0xe   : > { %1474 = dma.hbm_to_vmem [thread:$0]  (!%p1833_p5), %s302_s18, 16, %s304_s21, [#allocation8]  }
   0xf   : > { %s2092_s22 = smov (%p35_p6, %s33_s22), 0  ;;  %s264_s30 = sshll.u32 %s1746_s26, 4  ;;  %s265_s30 = int_to_ptr.vmem [resolvable:$true] %s264_s30 }
  0x10   : > { %s1748_s11 = smov 4   ;;  %s289_s15 = sshll.u32 %s2080_s3, 4  ;;  %s290_s15 = int_to_ptr.hbm [resolvable:$true] %s289_s15 }
  0x11   : > { %1465 = dma.hbm_to_vmem [thread:$0]  (!%p1833_p5), %s263_s25, 256, %s265_s30, [#allocation3], %s1747_s9, %s1747_s9, %s1748_s11  }
  0x12   : > { %s1749_s16 = smov [#allocation6]   ;;  %s313_s21 = sshll.u32 %s2082_s5, 4  ;;  %s314_s21 = int_to_ptr.hbm [resolvable:$true] %s313_s21 }
  0x13   : > { %s291_s17 = sshll.u32 %s1749_s16, 4  ;;  %s1750_s23 = smov [#allocation9]   ;;  %s292_s17 = int_to_ptr.vmem [resolvable:$true] %s291_s17 }
  0x14   : > { %1471 = dma.hbm_to_vmem [thread:$0]  (!%p1833_p5), %s290_s15, 16, %s292_s17, [#allocation5]  }
  0x15   : > { %s315_s24 = sshll.u32 %s1750_s23, 4  ;;  %357 = sbr.rel (%p1822_p3) target bundleno = 779 (0x30b), region = 52  ;;  %s316_s24 = int_to_ptr.vmem [resolvable:$true] %s315_s24 }
  0x16   : > { %1477 = dma.hbm_to_vmem [thread:$0]  (!%p1833_p5), %s314_s21, 64, %s316_s24, [#allocation8]  }
  0x1a   : > { %1721 = dma.done.wait (%p1818_p2), [#allocation3], 256  }
  0x1b   : > { %1723 = vsyncadd (%p1818_p2), [#allocation3], 4294967040 }
  0x1c   : > { %1725 = dma.done.wait (%p1818_p2), [#allocation5], 32  }
  0x1d   : > { %1727 = vsyncadd (%p1818_p2), [#allocation5], 4294967264 }
  0x1e   : > { %1729 = dma.done.wait (%p1818_p2), [#allocation8], 80  }
  0x1f   : > { %1731 = vsyncadd (%p1818_p2), [#allocation8], 4294967216  ;;  %p430_p7 = scmp.lt.s32.totalorder %s1734_s27, 1  ;;  %v1434_v0 = vld [vmem:[#allocation2 + $0x8] sm:$0xff]  ;;  %v1433_v1 = vld [vmem:[#allocation2] sm:$0xff]  ;;  %vm506_vm0 = vcmask 261120  }
  0x20   : > { %525 = vmatpush.bf16.msra.mxu0 %v1434_v0  ;;  %v548_v4 = vld [vmem:[#allocation9] sm:$0xf]  ;;  %v1523_v7 = vld [vmem:[#allocation4] ss:$0 sm:$0xff]  ;;  %vm835_vm1 = vcmask 1043456   ;;  %vm810_vm2 = vcmask 31744  }
  0x21   : > { %s2094_s27 = smov (!%p430_p7, %s1734_s27), 1  ;;  %1384 = vmatpush.xpose.msk.msra.mxu2 %vm506_vm0, %v548_v4  ;;  %1438 = vmatpush.xpose.msk.msra.mxu1 %vm506_vm0, %v548_v4 }
  0x22   : > { %s1428_s13 = sshll.u32 %s2094_s27, 5  ;;  %1439 = vmatpush.msk.msra.mxu3 %vm835_vm1, %v548_v4  ;;  %s1441_s12 = smul.u32 48, %s2094_s27 }
  0x23   : > { %s437_s26 = scalar_lea.vmem %s2077_s0, %s1428_s13  ;;  %s1440_s10 = smul.u32 24, %s2094_s27 }
  0x24   : > { %v1429_v2 = vld [vmem:[%s437_s26] sm:$0xff]  ;;  %526 = vmatpush.bf16.msra.mxu0 %v1433_v1  ;;  %v1430_v3 = vld [vmem:[%s437_s26 + $0x8] sm:$0xff]  ;;  %v1431_v5 = vld [vmem:[%s437_s26 + $0x10] sm:$0xff]  ;;  %1402 = vmatpush.msk.msrb.mxu3 %vm835_vm1, %v548_v4  ;;  %s2033_s11 = scalar_lea.vmem %s2084_s7, %s1441_s12  ;;  %s456_s20 = scalar_lea.vmem %s2085_s8, %s1441_s12 }
  0x25   : > { %v1432_v6 = vld [vmem:[%s437_s26 + $0x18] sm:$0xff]  ;;  %1393 = vmatpush.msk.msrb.mxu2 %vm835_vm1, %v548_v4  ;;  %s443_s16 = scalar_lea.vmem %s2083_s6, %s1440_s10 }
  0x27   : > { %1371 = vmatmul.msk.bf16.vlgmr.msra.gmra.mxu0 %vm506_vm0, %v1429_v2 }
  0x28   : > { %1375 = vmatpush.xpose.msk.msrb.mxu0 %vm506_vm0, %v548_v4 }
  0x37   : > { %1372 = vmatmul.msk.bf16.gmra.mxu0 %vm506_vm0, %v1430_v3 }
  0x47   : > { %1373 = vmatmul.msk.bf16.gmra.mxu0 %vm506_vm0, %v1431_v5 }
  0x57   : > { %1374 = vmatmul.msk.bf16.gmra.mxu0 %vm506_vm0, %v1432_v6 }
  0xa4   : > { %v528_v8 = vpop.f32.mrf.mxu0 }
  0xa5   : > { %v1888_v9 = vadd.f32 %v1523_v7, %v528_v8 }
  0xa7   : > { %1376 = vmatmul.msk.f32.vlgmr.msrb.gmra.mxu0 %vm506_vm0, %v1888_v9  ;;  %v625_v10 = vmul.f32 %v1888_v9, %v1888_v9 }
  0xa9   : > { %1385 = vmatmul.msk.f32.vlgmr.msra.gmra.mxu2 %vm506_vm0, %v625_v10 }
  0xac   : > { %v530_v11 = vpop.f32.mrf.mxu0 }
  0xad   : > { %v1895_v12 = vadd.f32 %v1523_v7, %v530_v11 }
  0xaf   : > { %1377 = vmatmul.msk.f32.gmra.mxu0 %vm506_vm0, %v1895_v12  ;;  %v626_v13 = vmul.f32 %v1895_v12, %v1895_v12 }
  0xb1   : > { %1386 = vmatmul.msk.f32.gmra.mxu2 %vm506_vm0, %v626_v13 }
  0xb4   : > { %v533_v14 = vpop.f32.mrf.mxu0 }
  0xb5   : > { %v1902_v15 = vadd.f32 %v1523_v7, %v533_v14 }
  0xb7   : > { %1378 = vmatmul.msk.f32.vlgmr.msra.gmra.mxu1 %vm506_vm0, %v1902_v15  ;;  %v627_v16 = vmul.f32 %v1902_v15, %v1902_v15 }
  0xb9   : > { %1387 = vmatmul.msk.f32.gmra.mxu2 %vm506_vm0, %v627_v16 }
  0xbc   : > { %v535_v17 = vpop.f32.mrf.mxu0 }
  0xbd   : > { %v1909_v18 = vadd.f32 %v1523_v7, %v535_v17 }
  0xbf   : > { %1379 = vmatmul.msk.f32.gmra.mxu1 %vm506_vm0, %v1909_v18  ;;  %v628_v19 = vmul.f32 %v1909_v18, %v1909_v18 }
  0xc1   : > { %1388 = vmatmul.msk.f32.gmra.mxu2 %vm506_vm0, %v628_v19 }
  0xc4   : > { %v538_v20 = vpop.f32.mrf.mxu0 }
  0xc5   : > { %v1916_v21 = vadd.f32 %v1523_v7, %v538_v20 }
  0xc7   : > { %1380 = vmatmul.msk.f32.gmra.mxu1 %vm506_vm0, %v1916_v21  ;;  %v629_v22 = vmul.f32 %v1916_v21, %v1916_v21 }
  0xc9   : > { %1389 = vmatmul.msk.f32.gmra.mxu2 %vm506_vm0, %v629_v22 }
  0xcc   : > { %v540_v23 = vpop.f32.mrf.mxu0 }
  0xcd   : > { %v1923_v24 = vadd.f32 %v1523_v7, %v540_v23 }
  0xcf   : > { %1381 = vmatmul.msk.f32.gmra.mxu1 %vm506_vm0, %v1923_v24  ;;  %v630_v25 = vmul.f32 %v1923_v24, %v1923_v24 }
  0xd1   : > { %1390 = vmatmul.msk.f32.gmra.mxu2 %vm506_vm0, %v630_v25 }
  0xd4   : > { %v543_v26 = vpop.f32.mrf.mxu0 }
  0xd5   : > { %v1930_v27 = vadd.f32 %v1523_v7, %v543_v26 }
  0xd7   : > { %1382 = vmatmul.msk.f32.gmra.mxu1 %vm506_vm0, %v1930_v27  ;;  %v631_v28 = vmul.f32 %v1930_v27, %v1930_v27 }
  0xd9   : > { %1391 = vmatmul.msk.f32.gmra.mxu2 %vm506_vm0, %v631_v28 }
  0xdc   : > { %v545_v29 = vpop.f32.mrf.mxu0 }
  0xdd   : > { %v1937_v30 = vadd.f32 %v1523_v7, %v545_v29 }
  0xdf   : > { %1383 = vmatmul.msk.f32.gmra.mxu1 %vm506_vm0, %v1937_v30  ;;  %v632_v31 = vmul.f32 %v1937_v30, %v1937_v30 }
  0xe1   : > { %1392 = vmatmul.msk.f32.gmra.mxu2 %vm506_vm0, %v632_v31 }
 0x124   : > { %v593_v32 = vpop.f32.mrf.mxu0 }
 0x125   : > { %v617_v33 = vmul.f32 0.125, %v593_v32 }
 0x127   : > { %1394 = vmatmul.msk.f32.vlgmr.msrb.gmra.mxu2 %vm810_vm2, %v617_v33  ;;  %v706_v43 = vmul.f32 %v617_v33, %v617_v33 }
 0x12c   : > { %v596_v34 = vpop.f32.mrf.mxu0  ;;  %v674_v35 = vpop.f32.mrf.mxu2 }
 0x12d   : > { %v618_v36 = vmul.f32 0.125, %v596_v34  ;;  %v698_v41 = vmul.f32 0.125, %v674_v35 }
 0x12f   : > { %1395 = vmatmul.msk.f32.gmra.mxu2 %vm810_vm2, %v618_v36  ;;  %v714_v45 = vsub.f32 %v698_v41, %v706_v43  ;;  %v707_v50 = vmul.f32 %v618_v36, %v618_v36 }
 0x131   : > { %v722_v47 = vadd.f32 1e-06, %v714_v45 }
 0x133   : > { %1526 = vrsqrt.f32 %v722_v47  ;;  %vm736_vm4 = vweird.f32 %v722_v47 }
 0x134   : > { %v599_v37 = vpop.f32.mrf.mxu1  ;;  %v677_v39 = vpop.f32.mrf.mxu2 }
 0x135   : > { %v619_v38 = vmul.f32 0.125, %v599_v37  ;;  %v699_v48 = vmul.f32 0.125, %v677_v39 }
 0x137   : > { %1396 = vmatmul.msk.f32.gmra.mxu2 %vm810_vm2, %v619_v38  ;;  %v715_v51 = vsub.f32 %v699_v48, %v707_v50  ;;  %v708_v58 = vmul.f32 %v619_v38, %v619_v38 }
 0x139   : > { %v723_v54 = vadd.f32 1e-06, %v715_v51  ;;  %v1527_v57 = vpop.eup %1526 }
 0x13a   : > { %v731_v60 = vmul.f32 %v1527_v57, %v722_v47  ;;  %vm737_vm3 = vweird.f32 %v1527_v57 }
 0x13b   : > { %1528 = vrsqrt.f32 %v723_v54  ;;  %vm738_vm5 = vmor %vm736_vm4, %vm737_vm3  ;;  %vm746_vm7 = vweird.f32 %v723_v54 }
 0x13c   : > { %v602_v40 = vpop.f32.mrf.mxu1  ;;  %v680_v44 = vpop.f32.mrf.mxu2  ;;  %v732_v2 = vmul.f32 %v1527_v57, %v731_v60 }
 0x13d   : > { %v620_v42 = vmul.f32 0.125, %v602_v40  ;;  %v700_v55 = vmul.f32 0.125, %v680_v44 }
 0x13e   : > { %v733_v6 = vmul.f32 0.5, %v732_v2 }
 0x13f   : > { %1397 = vmatmul.msk.f32.gmra.mxu2 %vm810_vm2, %v620_v42  ;;  %v716_v59 = vsub.f32 %v700_v55, %v708_v58  ;;  %v709_v4 = vmul.f32 %v620_v42, %v620_v42 }
 0x140   : > { %v734_v16 = vsub.f32 1.5, %v733_v6 }
 0x141   : > { %v1950_v63 = vadd.f32 1e-06, %v716_v59  ;;  %v1529_v3 = vpop.eup %1528 }
 0x142   : > { %v741_v7 = vmul.f32 %v1529_v3, %v723_v54  ;;  %v735_v25 = vmul.f32 %v1527_v57, %v734_v16  ;;  %vm747_vm6 = vweird.f32 %v1529_v3 }
 0x143   : > { %1530 = vrsqrt.f32 %v1950_v63  ;;  %vm748_vm8 = vmor %vm746_vm7, %vm747_vm6  ;;  %vm756_vm10 = vweird.f32 %v1950_v63 }
 0x144   : > { %v605_v46 = vpop.f32.mrf.mxu1  ;;  %v683_v52 = vpop.f32.mrf.mxu2  ;;  %v742_v17 = vmul.f32 %v1529_v3, %v741_v7  ;;  %v739_v31 = vsel %vm738_vm5, %v1527_v57, %v735_v25 }
 0x145   : > { %v621_v49 = vmul.f32 0.125, %v605_v46  ;;  %v701_v0 = vmul.f32 0.125, %v683_v52 }
 0x146   : > { %v743_v26 = vmul.f32 0.5, %v742_v17 }
 0x147   : > { %1398 = vmatmul.msk.f32.vlgmr.msra.gmra.mxu3 %vm810_vm2, %v621_v49  ;;  %v717_v5 = vsub.f32 %v701_v0, %v709_v4  ;;  %v710_v20 = vmul.f32 %v621_v49, %v621_v49 }
 0x148   : > { %v744_v32 = vsub.f32 1.5, %v743_v26 }
 0x149   : > { %v1954_v10 = vadd.f32 1e-06, %v717_v5  ;;  %v1531_v19 = vpop.eup %1530 }
 0x14a   : > { %v751_v23 = vmul.f32 %v1531_v19, %v1950_v63  ;;  %v745_v39 = vmul.f32 %v1529_v3, %v744_v32  ;;  %vm757_vm9 = vweird.f32 %v1531_v19 }
 0x14b   : > { %1532 = vrsqrt.f32 %v1954_v10  ;;  %vm758_vm11 = vmor %vm756_vm10, %vm757_vm9  ;;  %vm766_vm13 = vweird.f32 %v1954_v10 }
 0x14c   : > { %v608_v53 = vpop.f32.mrf.mxu1  ;;  %v686_v61 = vpop.f32.mrf.mxu2  ;;  %v752_v33 = vmul.f32 %v1531_v19, %v751_v23  ;;  %v749_v43 = vsel %vm748_vm8, %v1529_v3, %v745_v39 }
 0x14d   : > { %v622_v56 = vmul.f32 0.125, %v608_v53  ;;  %v702_v11 = vmul.f32 0.125, %v686_v61 }
 0x14e   : > { %v753_v40 = vmul.f32 0.5, %v752_v33 }
 0x14f   : > { %1399 = vmatmul.msk.f32.gmra.mxu3 %vm810_vm2, %v622_v56  ;;  %v718_v22 = vsub.f32 %v702_v11, %v710_v20  ;;  %v711_v35 = vmul.f32 %v622_v56, %v622_v56 }
 0x150   : > { %v754_v44 = vsub.f32 1.5, %v753_v40 }
 0x151   : > { %v1959_v28 = vadd.f32 1e-06, %v718_v22  ;;  %v1533_v34 = vpop.eup %1532 }
 0x152   : > { %v761_v38 = vmul.f32 %v1533_v34, %v1954_v10  ;;  %v755_v51 = vmul.f32 %v1531_v19, %v754_v44  ;;  %vm767_vm12 = vweird.f32 %v1533_v34 }
 0x153   : > { %1534 = vrsqrt.f32 %v1959_v28  ;;  %vm768_vm14 = vmor %vm766_vm13, %vm767_vm12  ;;  %vm776_vm1 = vweird.f32 %v1959_v28 }
 0x154   : > { %v611_v62 = vpop.f32.mrf.mxu1  ;;  %v689_v14 = vpop.f32.mrf.mxu2  ;;  %v762_v45 = vmul.f32 %v1533_v34, %v761_v38  ;;  %v759_v55 = vsel %vm758_vm11, %v1531_v19, %v755_v51 }
 0x155   : > { %v623_v1 = vmul.f32 0.125, %v611_v62  ;;  %v703_v29 = vmul.f32 0.125, %v689_v14 }
 0x156   : > { %v763_v52 = vmul.f32 0.5, %v762_v45 }
 0x157   : > { %1400 = vmatmul.msk.f32.gmra.mxu3 %vm810_vm2, %v623_v1  ;;  %v719_v37 = vsub.f32 %v703_v29, %v711_v35  ;;  %v712_v47 = vmul.f32 %v623_v1, %v623_v1 }
 0x158   : > { %v764_v56 = vsub.f32 1.5, %v763_v52 }
 0x159   : > { %v727_v41 = vadd.f32 1e-06, %v719_v37  ;;  %v1535_v46 = vpop.eup %1534  ;;  %v1979_v37 = vld [vmem:[#allocation6] ss:$0 sm:$0xff] }
 0x15a   : > { %v771_v49 = vmul.f32 %v1535_v46, %v1959_v28  ;;  %v765_v62 = vmul.f32 %v1533_v34, %v764_v56  ;;  %vm777_vm15 = vweird.f32 %v1535_v46 }
 0x15b   : > { %1536 = vrsqrt.f32 %v727_v41  ;;  %vm778_vm3 = vmor %vm776_vm1, %vm777_vm15  ;;  %vm786_vm5 = vweird.f32 %v727_v41 }
 0x15c   : > { %v614_v8 = vpop.f32.mrf.mxu1  ;;  %v692_v36 = vpop.f32.mrf.mxu2  ;;  %v772_v57 = vmul.f32 %v1535_v46, %v771_v49  ;;  %v769_v63 = vsel %vm768_vm14, %v1533_v34, %v765_v62 }
 0x15d   : > { %v624_v13 = vmul.f32 0.125, %v614_v8  ;;  %v704_v42 = vmul.f32 0.125, %v692_v36 }
 0x15e   : > { %v773_v0 = vmul.f32 0.5, %v772_v57 }
 0x15f   : > { %1401 = vmatmul.msk.f32.gmra.mxu3 %vm810_vm2, %v624_v13  ;;  %v720_v48 = vsub.f32 %v704_v42, %v712_v47  ;;  %v713_v59 = vmul.f32 %v624_v13, %v624_v13 }
 0x160   : > { %v774_v2 = vsub.f32 1.5, %v773_v0 }
 0x161   : > { %v728_v53 = vadd.f32 1e-06, %v720_v48  ;;  %v1537_v58 = vpop.eup %1536 }
 0x162   : > { %v781_v61 = vmul.f32 %v1537_v58, %v727_v41  ;;  %v775_v6 = vmul.f32 %v1535_v46, %v774_v2  ;;  %vm787_vm4 = vweird.f32 %v1537_v58  ;;  %v1983_v41 = vld [vmem:[#allocation7] ss:$0 sm:$0xff] }
 0x163   : > { %1538 = vrsqrt.f32 %v728_v53  ;;  %vm788_vm6 = vmor %vm786_vm5, %vm787_vm4  ;;  %vm796_vm8 = vweird.f32 %v728_v53 }
 0x164   : > { %v695_v50 = vpop.f32.mrf.mxu2  ;;  %v782_v3 = vmul.f32 %v1537_v58, %v781_v61  ;;  %v779_v8 = vsel %vm778_vm3, %v1535_v46, %v775_v6 }
 0x165   : > { %v705_v54 = vmul.f32 0.125, %v695_v50 }
 0x166   : > { %v783_v7 = vmul.f32 0.5, %v782_v3 }
 0x167   : > { %1403 = vmatmul.msk.f32.vlgmr.msrb.gmra.mxu3 %vm810_vm2, %v739_v31  ;;  %v721_v60 = vsub.f32 %v705_v54, %v713_v59 }
 0x168   : > { %v784_v11 = vsub.f32 1.5, %v783_v7 }
 0x169   : > { %v729_v1 = vadd.f32 1e-06, %v721_v60  ;;  %v1539_v4 = vpop.eup %1538 }
 0x16a   : > { %v791_v5 = vmul.f32 %v1539_v4, %v728_v53  ;;  %v785_v16 = vmul.f32 %v1537_v58, %v784_v11  ;;  %vm797_vm7 = vweird.f32 %v1539_v4 }
 0x16b   : > { %1540 = vrsqrt.f32 %v729_v1  ;;  %vm798_vm9 = vmor %vm796_vm8, %vm797_vm7  ;;  %vm806_vm11 = vweird.f32 %v729_v1 }
 0x16c   : > { %v792_v13 = vmul.f32 %v1539_v4, %v791_v5  ;;  %v789_v19 = vsel %vm788_vm6, %v1537_v58, %v785_v16 }
 0x16e   : > { %v793_v17 = vmul.f32 0.5, %v792_v13 }
 0x16f   : > { %1404 = vmatmul.msk.f32.gmra.mxu3 %vm810_vm2, %v749_v43 }
 0x170   : > { %v794_v20 = vsub.f32 1.5, %v793_v17 }
 0x171   : > { %v1541_v10 = vpop.eup %1540 }
 0x172   : > { %v801_v14 = vmul.f32 %v1541_v10, %v729_v1  ;;  %v795_v23 = vmul.f32 %v1539_v4, %v794_v20  ;;  %vm807_vm10 = vweird.f32 %v1541_v10 }
 0x173   : > { %vm808_vm12 = vmor %vm806_vm11, %vm807_vm10 }
 0x174   : > { %v802_v22 = vmul.f32 %v1541_v10, %v801_v14  ;;  %v799_v26 = vsel %vm798_vm9, %v1539_v4, %v795_v23 }
 0x176   : > { %v803_v25 = vmul.f32 0.5, %v802_v22 }
 0x177   : > { %1405 = vmatmul.msk.f32.gmra.mxu3 %vm810_vm2, %v759_v55 }
 0x178   : > { %v804_v28 = vsub.f32 1.5, %v803_v25 }
 0x17a   : > { %v805_v29 = vmul.f32 %v1541_v10, %v804_v28 }
 0x17c   : > { %v809_v31 = vsel %vm808_vm12, %v1541_v10, %v805_v29 }
 0x17f   : > { %1406 = vmatmul.msk.f32.gmra.mxu3 %vm810_vm2, %v769_v63 }
 0x187   : > { %1407 = vmatmul.msk.f32.gmra.mxu3 %vm810_vm2, %v779_v8 }
 0x18f   : > { %1408 = vmatmul.msk.f32.gmra.mxu3 %vm810_vm2, %v789_v19 }
 0x197   : > { %1409 = vmatmul.msk.f32.gmra.mxu3 %vm810_vm2, %v799_v26 }
 0x19f   : > { %1410 = vmatmul.msk.f32.gmra.mxu3 %vm810_vm2, %v809_v31  ;;  %vm1162_vm2 = vcmask 523264  }
 0x1aa   : > { %v855_v36 = vpop.f32.mrf.mxu2 }
 0x1ab   : > { %v944_v39 = vsub.f32 %v1888_v9, %v855_v36 }
 0x1b2   : > { %v858_v44 = vpop.f32.mrf.mxu2 }
 0x1b3   : > { %v945_v47 = vsub.f32 %v1895_v12, %v858_v44 }
 0x1ba   : > { %v861_v5 = vpop.f32.mrf.mxu2 }
 0x1c2   : > { %v864_v22 = vpop.f32.mrf.mxu2 }
 0x1c3   : > { %v947_v31 = vsub.f32 %v1909_v18, %v864_v22 }
 0x1ca   : > { %v867_v32 = vpop.f32.mrf.mxu3 }
 0x1cb   : > { %v948_v2 = vsub.f32 %v1916_v21, %v867_v32 }
 0x1d2   : > { %v870_v33 = vpop.f32.mrf.mxu3 }
 0x1d3   : > { %v949_v16 = vsub.f32 %v1923_v24, %v870_v33 }
 0x1da   : > { %v1975_v34 = vpop.f32.mrf.mxu3 }
 0x1db   : > { %v950_v36 = vsub.f32 %v1930_v27, %v1975_v34 }
 0x1e2   : > { %v1977_v35 = vpop.f32.mrf.mxu3 }
 0x1e3   : > { %v951_v34 = vsub.f32 %v1937_v30, %v1977_v35 }
 0x1ea   : > { %v920_v38 = vpop.f32.mrf.mxu3 }
 0x1eb   : > { %v956_v40 = vmul.f32 %v1979_v37, %v920_v38 }
 0x1ed   : > { %v964_v42 = vmul.f32 %v956_v40, %v944_v39  ;;  %v946_v39 = vsub.f32 %v1902_v15, %v861_v5 }
 0x1ef   : > { %v976_v43 = vadd.f32 %v1983_v41, %v964_v42 }
 0x1f1   : > { %v984_v45 = vmul.f32 %v976_v43, %v976_v43 }
 0x1f2   : > { %v923_v46 = vpop.f32.mrf.mxu3 }
 0x1f3   : > { %v957_v48 = vmul.f32 %v1979_v37, %v923_v46  ;;  %v992_v49 = vmul.f32 %v984_v45, %v976_v43 }
 0x1f5   : > { %v965_v50 = vmul.f32 %v957_v48, %v945_v47  ;;  %v1000_v51 = vmul.f32 0.044715, %v992_v49 }
 0x1f7   : > { %v977_v52 = vadd.f32 %v1983_v41, %v965_v50  ;;  %v1008_v9 = vadd.f32 %v1000_v51, %v976_v43 }
 0x1f9   : > { %v985_v53 = vmul.f32 %v977_v52, %v977_v52  ;;  %v1016_v54 = vmul.f32 0.7978846, %v1008_v9 }
 0x1fa   : > { %v926_v55 = vpop.f32.mrf.mxu3 }
 0x1fb   : > { %v993_v56 = vmul.f32 %v985_v53, %v977_v52  ;;  %1542 = vtanh.f32 %v1016_v54  ;;  %v958_v24 = vmul.f32 %v1979_v37, %v926_v55 }
 0x1fd   : > { %v1001_v57 = vmul.f32 0.044715, %v993_v56  ;;  %v966_v44 = vmul.f32 %v958_v24, %v946_v39  ;;  %v1751_v24 = vmov 0  }
 0x1fe   : > { %1520 = vset.pattern.permute.xlu0 %v1751_v24  ;;  %1521 = vset.pattern.permute.xlu1 %v1751_v24 }
 0x1ff   : > { %v1009_v58 = vadd.f32 %v1001_v57, %v977_v52  ;;  %v2015_v15 = vadd.f32 %v1983_v41, %v966_v44  ;;  %1522 = vset.pattern.permute.xlu2 %v1751_v24 }
 0x201   : > { %v1017_v59 = vmul.f32 0.7978846, %v1009_v58  ;;  %v1543_v61 = vpop.eup %1542  ;;  %v986_v55 = vmul.f32 %v2015_v15, %v2015_v15 }
 0x202   : > { %v929_v60 = vpop.f32.mrf.mxu3  ;;  %v1032_v12 = vadd.f32 1.0, %v1543_v61 }
 0x203   : > { %1544 = vtanh.f32 %v1017_v59  ;;  %v959_v26 = vmul.f32 %v1979_v37, %v929_v60 }
 0x204   : > { %v1040_v63 = vmul.f32 0.5, %v1032_v12  ;;  %v994_v12 = vmul.f32 %v986_v55, %v2015_v15 }
 0x205   : > { %v967_v40 = vmul.f32 %v959_v26, %v947_v31 }
 0x206   : > { %v1991_v7 = vmul.f32 %v1040_v63, %v976_v43 }
 0x207   : > { %v2010_v18 = vadd.f32 %v1983_v41, %v967_v40 }
 0x209   : > { %v1545_v62 = vpop.eup %1544 }
 0x20a   : > { %v932_v0 = vpop.f32.mrf.mxu3  ;;  %v1033_v1 = vadd.f32 1.0, %v1545_v62 }
 0x20b   : > { %v960_v3 = vmul.f32 %v1979_v37, %v932_v0 }
 0x20c   : > { %v1041_v4 = vmul.f32 0.5, %v1033_v1 }
 0x20d   : > { %v968_v6 = vmul.f32 %v960_v3, %v948_v2 }
 0x20e   : > { %v1993_v8 = vmul.f32 %v1041_v4, %v977_v52  ;;  %v987_v52 = vmul.f32 %v2010_v18, %v2010_v18 }
 0x20f   : > { %v980_v11 = vadd.f32 %v1983_v41, %v968_v6 }
 0x210   : > { %v1056_v13 = vpack.c.bf16 %v1993_v8, %v1991_v7  ;;  %v995_v59 = vmul.f32 %v987_v52, %v2010_v18  ;;  %v1437_v7 = vld [vmem:[%s443_s16 + $0x10] sm:$0xff] }
 0x211   : > { %v988_v10 = vmul.f32 %v980_v11, %v980_v11 }
 0x212   : > { %v935_v14 = vpop.f32.mrf.mxu3  ;;  %v1003_v1 = vmul.f32 0.044715, %v995_v59 }
 0x213   : > { %v961_v21 = vmul.f32 %v1979_v37, %v935_v14  ;;  %v996_v17 = vmul.f32 %v988_v10, %v980_v11 }
 0x214   : > { %v1011_v6 = vadd.f32 %v1003_v1, %v2010_v18 }
 0x215   : > { %v969_v19 = vmul.f32 %v961_v21, %v949_v16  ;;  %v1004_v20 = vmul.f32 0.044715, %v996_v17 }
 0x216   : > { %v1019_v16 = vmul.f32 0.7978846, %v1011_v6 }
 0x217   : > { %v981_v23 = vadd.f32 %v1983_v41, %v969_v19  ;;  %v1012_v25 = vadd.f32 %v1004_v20, %v980_v11 }
 0x219   : > { %v989_v28 = vmul.f32 %v981_v23, %v981_v23  ;;  %v1020_v29 = vmul.f32 0.7978846, %v1012_v25 }
 0x21a   : > { %v938_v32 = vpop.f32.mrf.mxu3 }
 0x21b   : > { %v962_v33 = vmul.f32 %v1979_v37, %v938_v32  ;;  %v997_v38 = vmul.f32 %v989_v28, %v981_v23  ;;  %1546 = vtanh.f32 %v1020_v29 }
 0x21d   : > { %v970_v42 = vmul.f32 %v962_v33, %v950_v36  ;;  %v1005_v43 = vmul.f32 0.044715, %v997_v38  ;;  %v1066_v36 = vld [vmem:[%s2033_s11] sm:$0xff] }
 0x21e   : > { %1074 = vperm.xlu0 %1520, %v1066_v36  }
 0x21f   : > { %v982_v45 = vadd.f32 %v1983_v41, %v970_v42  ;;  %v1013_v46 = vadd.f32 %v1005_v43, %v981_v23 }
 0x221   : > { %v990_v47 = vmul.f32 %v982_v45, %v982_v45  ;;  %v1021_v27 = vmul.f32 0.7978846, %v1013_v46  ;;  %v1547_v49 = vpop.eup %1546  ;;  %v1067_v46 = vld [vmem:[%s2033_s11 + $0x8] sm:$0xff] }
 0x222   : > { %v941_v48 = vpop.f32.mrf.mxu3  ;;  %v1036_v54 = vadd.f32 1.0, %v1547_v49  ;;  %v1071_v49 = vld [vmem:[%s2033_s11 + $0x28] sm:$0xff] }
 0x223   : > { %v963_v50 = vmul.f32 %v1979_v37, %v941_v48  ;;  %v998_v51 = vmul.f32 %v990_v47, %v982_v45  ;;  %1548 = vtanh.f32 %v1021_v27  ;;  %v1068_v47 = vld [vmem:[%s2033_s11 + $0x10] sm:$0xff]  ;;  %v1435_v27 = vld [vmem:[%s443_s16] sm:$0xff] }
 0x224   : > { %v1044_v60 = vmul.f32 0.5, %v1036_v54  ;;  %1084 = vperm.xlu1 %1521, %v1068_v47   ;;  %v1070_v48 = vld [vmem:[%s2033_s11 + $0x20] sm:$0xff] }
 0x225   : > { %v971_v9 = vmul.f32 %v963_v50, %v951_v34  ;;  %v1006_v53 = vmul.f32 0.044715, %v998_v51  ;;  %v1069_v34 = vld [vmem:[%s2033_s11 + $0x18] sm:$0xff]  ;;  %1094 = vperm.xlu2 %1522, %v1070_v48  }
 0x226   : > { %v1052_v63 = vmul.f32 %v1044_v60, %v980_v11  ;;  %1079 = vperm.xlu0 %1520, %v1067_v46  }
 0x227   : > { %v983_v30 = vadd.f32 %v1983_v41, %v971_v9  ;;  %v1014_v35 = vadd.f32 %v1006_v53, %v982_v45  ;;  %v1002_v41 = vmul.f32 0.044715, %v994_v12 }
 0x229   : > { %v1549_v56 = vpop.eup %1548  ;;  %v991_v57 = vmul.f32 %v983_v30, %v983_v30  ;;  %v1022_v58 = vmul.f32 0.7978846, %v1014_v35  ;;  %v1010_v14 = vadd.f32 %v1002_v41, %v2015_v15 }
 0x22a   : > { %v1037_v37 = vadd.f32 1.0, %v1549_v56 }
 0x22b   : > { %v999_v61 = vmul.f32 %v991_v57, %v983_v30  ;;  %1550 = vtanh.f32 %v1022_v58  ;;  %v1018_v17 = vmul.f32 0.7978846, %v1010_v14 }
 0x22c   : > { %v1045_v62 = vmul.f32 0.5, %v1037_v37  ;;  %1089 = vperm.xlu1 %1521, %v1069_v34  }
 0x22d   : > { %v1007_v0 = vmul.f32 0.044715, %v999_v61  ;;  %1099 = vperm.xlu2 %1522, %v1071_v49  }
 0x22e   : > { %v1053_v2 = vmul.f32 %v1045_v62, %v981_v23 }
 0x22f   : > { %v1015_v3 = vadd.f32 %v1007_v0, %v983_v30 }
 0x230   : > { %v1058_v4 = vpack.c.bf16 %v1053_v2, %v1052_v63 }
 0x231   : > { %v1023_v5 = vmul.f32 0.7978846, %v1015_v3  ;;  %v1551_v10 = vpop.eup %1550 }
 0x232   : > { %v1038_v21 = vadd.f32 1.0, %v1551_v10  ;;  %v1133_v40 = vsel %vm506_vm0, %v1058_v4, 0 }
 0x233   : > { %1552 = vtanh.f32 %v1023_v5 }
 0x234   : > { %1554 = vtanh.f32 %v1019_v16  ;;  %v1046_v11 = vmul.f32 0.5, %v1038_v21 }
 0x235   : > { %1556 = vtanh.f32 %v1018_v17 }
 0x236   : > { %v1054_v23 = vmul.f32 %v1046_v11, %v982_v45 }
 0x239   : > { %v1553_v19 = vpop.eup %1552 }
 0x23a   : > { %v1039_v20 = vadd.f32 1.0, %v1553_v19  ;;  %v1555_v26 = vpop.eup %1554 }
 0x23b   : > { %v1557_v29 = vpop.eup %1556  ;;  %v1035_v32 = vadd.f32 1.0, %v1555_v26 }
 0x23c   : > { %v1047_v22 = vmul.f32 0.5, %v1039_v20  ;;  %v1034_v33 = vadd.f32 1.0, %v1557_v29 }
 0x23d   : > { %v1043_v38 = vmul.f32 0.5, %v1035_v32 }
 0x23e   : > { %v1055_v25 = vmul.f32 %v1047_v22, %v983_v30  ;;  %v1042_v39 = vmul.f32 0.5, %v1034_v33 }
 0x23f   : > { %v1051_v42 = vmul.f32 %v1043_v38, %v2010_v18  ;;  %v1127_v18 = vsel %vm506_vm0, %v1056_v13, 0 }
 0x240   : > { %v1059_v28 = vpack.c.bf16 %v1055_v25, %v1054_v23  ;;  %v1050_v43 = vmul.f32 %v1042_v39, %v2015_v15  ;;  %v1436_v15 = vld [vmem:[%s443_s16 + $0x8] sm:$0xff] }
 0x242   : > { %v1136_v31 = vsel %vm506_vm0, %v1059_v28, 0  ;;  %v1057_v44 = vpack.c.bf16 %v1051_v42, %v1050_v43 }
 0x243   : > { %1142 = vmatpush.bf16.xpose.msrb.mxu1 %v1136_v31 }
 0x244   : > { %v1130_v45 = vsel %vm506_vm0, %v1057_v44, 0 }
 0x24b   : > { %1143 = vmatpush.bf16.xpose.msrb.mxu1 %v1133_v40 }
 0x253   : > { %1144 = vmatpush.bf16.xpose.msrb.mxu1 %v1130_v45 }
 0x25b   : > { %1145 = vmatpush.bf16.xpose.msrb.mxu1 %v1127_v18 }
 0x262   : > { %1423 = vmatmul.msk.bf16.vlgmr.msrb.gmra.mxu1 %vm506_vm0, %v1435_v27 }
 0x272   : > { %1424 = vmatmul.msk.bf16.gmra.mxu1 %vm506_vm0, %v1436_v15 }
 0x27f   : > { %v1095_v57 = vpop.permute.xlu2 %1094 }
 0x282   : > { %1425 = vmatmul.msk.bf16.gmra.mxu1 %vm506_vm0, %v1437_v7 }
 0x287   : > { %v1100_v37 = vpop.permute.xlu2 %1099 }
 0x290   : > { %v1075_v8 = vpop.permute.xlu0 %1074 }
 0x296   : > { %v1085_v53 = vpop.permute.xlu1 %1084 }
 0x298   : > { %v1080_v51 = vpop.permute.xlu0 %1079 }
 0x29e   : > { %v1090_v30 = vpop.permute.xlu1 %1089 }
 0x2df   : > { %v1147_v13 = vpop.f32.mrf.mxu1 }
 0x2e0   : > { %v1148_v50 = vadd.f32 %v1147_v13, %v1075_v8 }
 0x2e2   : > { %1163 = vst.msk [vmem:[%s456_s20] sm:$0xff] %vm1162_vm2, %v1148_v50 }
 0x2e7   : > { %v1149_v52 = vpop.f32.mrf.mxu1 }
 0x2e8   : > { %v1150_v9 = vadd.f32 %v1149_v52, %v1080_v51 }
 0x2ea   : > { %1164 = vst.msk [vmem:[%s456_s20 + $0x8] sm:$0xff] %vm1162_vm2, %v1150_v9 }
 0x2ef   : > { %v1152_v54 = vpop.f32.mrf.mxu1 }
 0x2f0   : > { %v1153_v55 = vadd.f32 %v1152_v54, %v1085_v53 }
 0x2f2   : > { %1165 = vst.msk [vmem:[%s456_s20 + $0x10] sm:$0xff] %vm1162_vm2, %v1153_v55 }
 0x2f7   : > { %v1154_v35 = vpop.f32.mrf.mxu1 }
 0x2f8   : > { %v1155_v56 = vadd.f32 %v1154_v35, %v1090_v30 }
 0x2fa   : > { %1166 = vst.msk [vmem:[%s456_s20 + $0x18] sm:$0xff] %vm1162_vm2, %v1155_v56 }
 0x2ff   : > { %v1157_v58 = vpop.f32.mrf.mxu1 }
 0x300   : > { %v1158_v59 = vadd.f32 %v1157_v58, %v1095_v57 }
 0x302   : > { %1167 = vst.msk [vmem:[%s456_s20 + $0x20] sm:$0xff] %vm1162_vm2, %v1158_v59 }
 0x307   : > { %v1159_v60 = vpop.f32.mrf.mxu1 }
 0x308   : > { %v1160_v61 = vadd.f32 %v1159_v60, %v1100_v37 }
 0x30a   : > { %1168 = vst.msk [vmem:[%s456_s20 + $0x28] sm:$0xff] %vm1162_vm2, %v1160_v61 }
 0x30b PF: > { %s21_s29 = sadd.s32 1, %s1742_s29   ;;  %s2089_s27 = smov %s1738_s28 }
 0x30c   : > { %p18_p8 = scmp.ge.s32.totalorder %s21_s29, 4   ;;  %s2090_s28 = smov %s2092_s22 }
 0x30e   :  { %20 = sbr.rel (!%p18_p8) target bundleno = 4 (0x4), region = 109 }
 0x313   :  { %1196 = vsyncpa [#allocation3], 1 }
 0x314   :  { %1198 = vsyncpa [#allocation3 + $0x1], 1 }
 0x315   :  { %1199 = vsyncpa [#allocation5], 1 }
 0x316   :  { %1200 = vsyncpa [#allocation8], 1 }

</bundles_post_ra>
